<compile_context>
chip_gen: v5e
topology: v5e:2x2
jax: 0.10.0
libtpu: 0.0.40
codegen_flags: <defaults>
</compile_context>

<pallas_src>
import functools

import jax
import jax.numpy as jnp
from jax.experimental import pallas as pl
from jax.experimental.pallas import tpu as pltpu


# ----------------------------- Pallas kernel -------------------------------
def _up_cat_kernel(x2_ref, rwt_ref, rh_ref, wf_ref, shift_ref, x1_ref, o_ref,
                   zw_ref, *, c_in, c_out, h2):
    """One grid step = (image n, tile t of H1 rows).

    x2_ref   : (C_in*H2, W2)    VMEM  low-res features of image n (resident over t)
    rwt_ref  : (W2, W1)         VMEM  width-interp weights (transposed)
    rh_ref   : (TH1, H2)        VMEM  height-interp rows for this tile
    wf_ref   : (C_out, C_in)    SMEM  conv weight with BN scale folded in
    shift_ref: (C_out,)         SMEM  folded conv bias + BN shift
    x1_ref   : (C_out, TH1, W1) VMEM  skip-connection tile (native NCHW layout)
    o_ref    : (C_out, TH1, W1) VMEM  output tile
    zw_ref   : (C_out*H2, W1)   VMEM  scratch: conv'ed + width-interpolated image
    """
    # ---- Stage 1: once per image (first H1-tile of each n) -----------------
    @pl.when(pl.program_id(1) == 0)
    def _():
        # Width interpolation of every input channel at once (lanes = W):
        #   (C_in*H2, W2) @ (W2, W1) -> (C_in*H2, W1)
        xw = jnp.dot(x2_ref[...], rwt_ref[...], preferred_element_type=jnp.float32)
        # Folded 1x1 conv (+ BN scale): contract the tiny C_in with SMEM scalars.
        for co in range(c_out):
            acc = wf_ref[co, 0] * xw[0:h2, :]
            for ci in range(1, c_in):
                acc = acc + wf_ref[co, ci] * xw[ci * h2:(ci + 1) * h2, :]
            zw_ref[co * h2:(co + 1) * h2, :] = acc

    # ---- Stage 2: per H1-tile ----------------------------------------------
    # Height interpolation (MXU) + fused shift / skip-add / ReLU epilogue (VPU).
    for co in range(c_out):
        u = jnp.dot(rh_ref[...], zw_ref[co * h2:(co + 1) * h2, :],
                    preferred_element_type=jnp.float32)             # (TH1, W1)
        v = x1_ref[co].astype(jnp.float32) + u + shift_ref[co]
        o_ref[co] = jnp.maximum(v, 0.0).astype(o_ref.dtype)


# ------------------------------ glue (JAX) ----------------------------------
def _interp_matrix(out_size, in_size, dtype=jnp.float32):
    """PyTorch bilinear, align_corners=False, as a (out_size, in_size) matrix."""
    scale = in_size / out_size
    d = (jnp.arange(out_size, dtype=jnp.float32) + 0.5) * scale - 0.5
    d = jnp.maximum(d, 0.0)
    lo = jnp.minimum(jnp.floor(d).astype(jnp.int32), in_size - 1)
    hi = jnp.minimum(lo + 1, in_size - 1)
    frac = d - lo.astype(jnp.float32)
    rows = jnp.arange(out_size)
    M = jnp.zeros((out_size, in_size), dtype)
    M = M.at[rows, lo].add((1.0 - frac).astype(dtype))
    M = M.at[rows, hi].add(frac.astype(dtype))
    return M


def _pick_tile_h(h1):
    """Largest multiple-of-8 divisor of H1 (capped) that still gives >= 2 tiles."""
    if h1 % 8 == 0:
        for cand in (64, 32, 16, 8):
            if cand < h1 and h1 % cand == 0:
                return cand
    return h1


def up_cat(x1, x2, conv_w, conv_b, bn_gamma, bn_beta, bn_mean, bn_var, eps=1e-5):
    # x1: (N, C_out, H1, W1) NCHW skip  |  x2: (N, C_in, H2, W2) NCHW low-res
    N, C_out, H1, W1 = x1.shape
    _, C_in, H2, W2 = x2.shape

    # Fold Conv2d(1x1) + eval-mode BatchNorm2d: y = W_fold @ x + shift.
    # TODO(synk): PyTorch BatchNorm2d in train mode uses batch statistics; this is the
    # inference-mode (running-stats) semantics.
    s = (bn_gamma / jnp.sqrt(bn_var + eps)).astype(jnp.float32)
    w_fold = conv_w.reshape(C_out, C_in).astype(jnp.float32) * s[:, None]   # (C_out, C_in)
    shift = ((conv_b - bn_mean) * s + bn_beta).astype(jnp.float32)          # (C_out,)

    # Separable bilinear (align_corners=False) interpolation weights.
    rh = _interp_matrix(H1, H2)                       # (H1, H2)
    rw_t = _interp_matrix(W1, W2).T                   # (W2, W1)

    # Channels-first / spatial-last: free reshape of NCHW (no HBM transpose).
    x2_f = x2.reshape(N, C_in * H2, W2)

    tile_h = _pick_tile_h(H1)
    grid = (N, H1 // tile_h)

    kernel = functools.partial(_up_cat_kernel, c_in=C_in, c_out=C_out, h2=H2)

    out = pl.pallas_call(
        kernel,
        out_shape=jax.ShapeDtypeStruct((N, C_out, H1, W1), x1.dtype),
        grid_spec=pltpu.PrefetchScalarGridSpec(
            num_scalar_prefetch=0,
            grid=grid,
            in_specs=[
                # x2 of image n, resident across the inner H1-tile loop.
                pl.BlockSpec((None, C_in * H2, W2), lambda n, t: (n, 0, 0)),
                # Width / height interpolation weights.
                pl.BlockSpec((W2, W1), lambda n, t: (0, 0)),
                pl.BlockSpec((tile_h, H2), lambda n, t: (t, 0)),
                # Folded conv weight + shift as SMEM scalars.
                pl.BlockSpec(memory_space=pltpu.MemorySpace.SMEM),
                pl.BlockSpec(memory_space=pltpu.MemorySpace.SMEM),
                # Skip connection tile (native NCHW, no transpose).
                pl.BlockSpec((None, C_out, tile_h, W1), lambda n, t: (n, 0, t, 0)),
            ],
            out_specs=pl.BlockSpec((None, C_out, tile_h, W1),
                                   lambda n, t: (n, 0, t, 0)),
            scratch_shapes=[pltpu.VMEM((C_out * H2, W1), jnp.float32)],
        ),
        compiler_params=pltpu.CompilerParams(
            dimension_semantics=("parallel", "arbitrary")),
    )(x2_f, rw_t, rh, w_fold, shift, x1)

    return out


# --------------------------- pure-JAX reference -----------------------------
def up_cat_ref(x1, x2, conv_w, conv_b, g, b, m, v, eps=1e-5):
    N, C_in, H2, W2 = x2.shape
    C_out = conv_w.shape[0]
    H1, W1 = x1.shape[2], x1.shape[3]
    z = jnp.einsum('nchw,oc->nohw', x2, conv_w.reshape(C_out, C_in)) \
        + conv_b[None, :, None, None]
    z = (z - m[None, :, None, None]) / jnp.sqrt(v + eps)[None, :, None, None] \
        * g[None, :, None, None] + b[None, :, None, None]
    Rh = _interp_matrix(H1, H2)
    Rw = _interp_matrix(W1, W2)
    z = jnp.einsum('ph,nchw->ncpw', Rh, z)
    z = jnp.einsum('qw,ncpw->ncpq', Rw, z)
    return jnp.maximum(x1 + z, 0.0)


if __name__ == "__main__":
    key = jax.random.PRNGKey(0)
    k1, k2, k3, k4, k5, k6, k7, k8 = jax.random.split(key, 8)

    # in_channels=8 (x2), out_channels=4 (x1); x2 is lower resolution.
    N, C_in, C_out = 2, 8, 4
    H1 = W1 = 16
    H2 = W2 = 8

    x1 = jax.random.normal(k1, (N, C_out, H1, W1), jnp.float32)
    x2 = jax.random.normal(k2, (N, C_in, H2, W2), jnp.float32)

    # Deterministic synthetic parameters (Conv2d 1x1 + BatchNorm2d, eval mode).
    conv_w = jax.random.normal(k3, (C_out, C_in, 1, 1), jnp.float32) * 0.1
    conv_b = jax.random.normal(k4, (C_out,), jnp.float32) * 0.1
    bn_gamma = 1.0 + 0.1 * jax.random.normal(k5, (C_out,), jnp.float32)
    bn_beta = 0.1 * jax.random.normal(k6, (C_out,), jnp.float32)
    bn_mean = 0.1 * jax.random.normal(k7, (C_out,), jnp.float32)
    bn_var = jnp.abs(jax.random.normal(k8, (C_out,), jnp.float32)) + 0.5

    out = up_cat(x1, x2, conv_w, conv_b, bn_gamma, bn_beta, bn_mean, bn_var)
    out = jax.block_until_ready(out)

    ref = up_cat_ref(x1, x2, conv_w, conv_b, bn_gamma, bn_beta, bn_mean, bn_var)
    assert out.shape == (N, C_out, H1, W1)
    assert jnp.allclose(out, ref, rtol=1e-3, atol=1e-3), \
        float(jnp.max(jnp.abs(out - ref)))

    print("KERNEL_OK")
</pallas_src>

<mosaic_0001>
module attributes {stable_mosaic.version = 11 : i64} {
  func.func @_up_cat_kernel(%arg0: i32, %arg1: i32, %arg2: memref<1x64x8xf32, #tpu.memory_space<vmem>>, %arg3: memref<8x16xf32, #tpu.memory_space<vmem>>, %arg4: memref<8x8xf32, #tpu.memory_space<vmem>>, %arg5: memref<4x8xf32, #tpu.memory_space<smem>>, %arg6: memref<4xf32, #tpu.memory_space<smem>>, %arg7: memref<1x4x8x16xf32, #tpu.memory_space<vmem>>, %arg8: memref<1x4x8x16xf32, #tpu.memory_space<vmem>>, %arg9: memref<32x16xf32, #tpu.memory_space<vmem>>) attributes {dimension_semantics = [#tpu.dimension_semantics<parallel>, #tpu.dimension_semantics<arbitrary>], iteration_bounds = array<i64: 2, 2>, scalar_prefetch = 0 : i64, scratch_operands = 1 : i64, tpu.core_type = #tpu.core_type<tc>, window_params = [{transform_indices = @transform_0, window_bounds = array<i64: 1, 64, 8>}, {pipeline_mode = #tpu.pipeline_mode<synchronous>, transform_indices = @transform_1, window_bounds = array<i64: 8, 16>}, {transform_indices = @transform_2, window_bounds = array<i64: 8, 8>}, {transform_indices = @transform_3, window_bounds = array<i64: 4, 8>}, {transform_indices = @transform_4, window_bounds = array<i64: 4>}, {transform_indices = @transform_5, window_bounds = array<i64: 1, 4, 8, 16>}, {transform_indices = @transform_6, window_bounds = array<i64: 1, 4, 8, 16>}]} {
    %c0_i32 = arith.constant 0 : i32
    %0 = arith.cmpi eq, %arg1, %c0_i32 : i32
    %1 = arith.extui %0 : i1 to i32
    %c0_i32_0 = arith.constant 0 : i32
    %2 = arith.cmpi ne, %1, %c0_i32_0 : i32
    scf.if %2 {
      %c0_53 = arith.constant 0 : index
      %c0_54 = arith.constant 0 : index
      %c0_55 = arith.constant 0 : index
      %59 = vector.load %arg2[%c0_53, %c0_54, %c0_55] : memref<1x64x8xf32, #tpu.memory_space<vmem>>, vector<1x64x8xf32>
      %60 = vector.shape_cast %59 : vector<1x64x8xf32> to vector<64x8xf32>
      %c0_56 = arith.constant 0 : index
      %c0_57 = arith.constant 0 : index
      %61 = vector.load %arg3[%c0_56, %c0_57] : memref<8x16xf32, #tpu.memory_space<vmem>>, vector<8x16xf32>
      %cst_58 = arith.constant dense<0.000000e+00> : vector<64x16xf32>
      %62 = tpu.matmul %60, %61, %cst_58 {dimension_numbers = #tpu.dot_dimension_numbers<[1], [0], [0], [1], [0, 0, 1, 1], [], []>} : vector<64x8xf32>, vector<8x16xf32>, vector<64x16xf32> -> vector<64x16xf32>
      %c0_59 = arith.constant 0 : index
      %c0_60 = arith.constant 0 : index
      %63 = memref.load %arg5[%c0_59, %c0_60] : memref<4x8xf32, #tpu.memory_space<smem>>
      %64 = vector.extract_strided_slice %62 {offsets = [0, 0], sizes = [8, 16], strides = [1, 1]} : vector<64x16xf32> to vector<8x16xf32>
      %65 = vector.broadcast %63 : f32 to vector<8x16xf32>
      %66 = arith.mulf %65, %64 : vector<8x16xf32>
      %c0_61 = arith.constant 0 : index
      %c1_62 = arith.constant 1 : index
      %67 = memref.load %arg5[%c0_61, %c1_62] : memref<4x8xf32, #tpu.memory_space<smem>>
      %68 = vector.extract_strided_slice %62 {offsets = [8, 0], sizes = [8, 16], strides = [1, 1]} : vector<64x16xf32> to vector<8x16xf32>
      %69 = vector.broadcast %67 : f32 to vector<8x16xf32>
      %70 = arith.mulf %69, %68 : vector<8x16xf32>
      %71 = arith.addf %66, %70 : vector<8x16xf32>
      %c0_63 = arith.constant 0 : index
      %c2_64 = arith.constant 2 : index
      %72 = memref.load %arg5[%c0_63, %c2_64] : memref<4x8xf32, #tpu.memory_space<smem>>
      %73 = vector.extract_strided_slice %62 {offsets = [16, 0], sizes = [8, 16], strides = [1, 1]} : vector<64x16xf32> to vector<8x16xf32>
      %74 = vector.broadcast %72 : f32 to vector<8x16xf32>
      %75 = arith.mulf %74, %73 : vector<8x16xf32>
      %76 = arith.addf %71, %75 : vector<8x16xf32>
      %c0_65 = arith.constant 0 : index
      %c3_66 = arith.constant 3 : index
      %77 = memref.load %arg5[%c0_65, %c3_66] : memref<4x8xf32, #tpu.memory_space<smem>>
      %78 = vector.extract_strided_slice %62 {offsets = [24, 0], sizes = [8, 16], strides = [1, 1]} : vector<64x16xf32> to vector<8x16xf32>
      %79 = vector.broadcast %77 : f32 to vector<8x16xf32>
      %80 = arith.mulf %79, %78 : vector<8x16xf32>
      %81 = arith.addf %76, %80 : vector<8x16xf32>
      %c0_67 = arith.constant 0 : index
      %c4 = arith.constant 4 : index
      %82 = memref.load %arg5[%c0_67, %c4] : memref<4x8xf32, #tpu.memory_space<smem>>
      %83 = vector.extract_strided_slice %62 {offsets = [32, 0], sizes = [8, 16], strides = [1, 1]} : vector<64x16xf32> to vector<8x16xf32>
      %84 = vector.broadcast %82 : f32 to vector<8x16xf32>
      %85 = arith.mulf %84, %83 : vector<8x16xf32>
      %86 = arith.addf %81, %85 : vector<8x16xf32>
      %c0_68 = arith.constant 0 : index
      %c5 = arith.constant 5 : index
      %87 = memref.load %arg5[%c0_68, %c5] : memref<4x8xf32, #tpu.memory_space<smem>>
      %88 = vector.extract_strided_slice %62 {offsets = [40, 0], sizes = [8, 16], strides = [1, 1]} : vector<64x16xf32> to vector<8x16xf32>
      %89 = vector.broadcast %87 : f32 to vector<8x16xf32>
      %90 = arith.mulf %89, %88 : vector<8x16xf32>
      %91 = arith.addf %86, %90 : vector<8x16xf32>
      %c0_69 = arith.constant 0 : index
      %c6 = arith.constant 6 : index
      %92 = memref.load %arg5[%c0_69, %c6] : memref<4x8xf32, #tpu.memory_space<smem>>
      %93 = vector.extract_strided_slice %62 {offsets = [48, 0], sizes = [8, 16], strides = [1, 1]} : vector<64x16xf32> to vector<8x16xf32>
      %94 = vector.broadcast %92 : f32 to vector<8x16xf32>
      %95 = arith.mulf %94, %93 : vector<8x16xf32>
      %96 = arith.addf %91, %95 : vector<8x16xf32>
      %c0_70 = arith.constant 0 : index
      %c7 = arith.constant 7 : index
      %97 = memref.load %arg5[%c0_70, %c7] : memref<4x8xf32, #tpu.memory_space<smem>>
      %98 = vector.extract_strided_slice %62 {offsets = [56, 0], sizes = [8, 16], strides = [1, 1]} : vector<64x16xf32> to vector<8x16xf32>
      %99 = vector.broadcast %97 : f32 to vector<8x16xf32>
      %100 = arith.mulf %99, %98 : vector<8x16xf32>
      %101 = arith.addf %96, %100 : vector<8x16xf32>
      %c0_71 = arith.constant 0 : index
      %c0_72 = arith.constant 0 : index
      %102 = vector.load %arg9[%c0_71, %c0_72] : memref<32x16xf32, #tpu.memory_space<vmem>>, vector<8x16xf32>
      tpu.vector_store %arg9[%c0_71, %c0_72], %101 {strides = array<i32>} : memref<32x16xf32, #tpu.memory_space<vmem>>, vector<8x16xf32>,
      %c1_73 = arith.constant 1 : index
      %c0_74 = arith.constant 0 : index
      %103 = memref.load %arg5[%c1_73, %c0_74] : memref<4x8xf32, #tpu.memory_space<smem>>
      %104 = vector.extract_strided_slice %62 {offsets = [0, 0], sizes = [8, 16], strides = [1, 1]} : vector<64x16xf32> to vector<8x16xf32>
      %105 = vector.broadcast %103 : f32 to vector<8x16xf32>
      %106 = arith.mulf %105, %104 : vector<8x16xf32>
      %c1_75 = arith.constant 1 : index
      %c1_76 = arith.constant 1 : index
      %107 = memref.load %arg5[%c1_75, %c1_76] : memref<4x8xf32, #tpu.memory_space<smem>>
      %108 = vector.extract_strided_slice %62 {offsets = [8, 0], sizes = [8, 16], strides = [1, 1]} : vector<64x16xf32> to vector<8x16xf32>
      %109 = vector.broadcast %107 : f32 to vector<8x16xf32>
      %110 = arith.mulf %109, %108 : vector<8x16xf32>
      %111 = arith.addf %106, %110 : vector<8x16xf32>
      %c1_77 = arith.constant 1 : index
      %c2_78 = arith.constant 2 : index
      %112 = memref.load %arg5[%c1_77, %c2_78] : memref<4x8xf32, #tpu.memory_space<smem>>
      %113 = vector.extract_strided_slice %62 {offsets = [16, 0], sizes = [8, 16], strides = [1, 1]} : vector<64x16xf32> to vector<8x16xf32>
      %114 = vector.broadcast %112 : f32 to vector<8x16xf32>
      %115 = arith.mulf %114, %113 : vector<8x16xf32>
      %116 = arith.addf %111, %115 : vector<8x16xf32>
      %c1_79 = arith.constant 1 : index
      %c3_80 = arith.constant 3 : index
      %117 = memref.load %arg5[%c1_79, %c3_80] : memref<4x8xf32, #tpu.memory_space<smem>>
      %118 = vector.extract_strided_slice %62 {offsets = [24, 0], sizes = [8, 16], strides = [1, 1]} : vector<64x16xf32> to vector<8x16xf32>
      %119 = vector.broadcast %117 : f32 to vector<8x16xf32>
      %120 = arith.mulf %119, %118 : vector<8x16xf32>
      %121 = arith.addf %116, %120 : vector<8x16xf32>
      %c1_81 = arith.constant 1 : index
      %c4_82 = arith.constant 4 : index
      %122 = memref.load %arg5[%c1_81, %c4_82] : memref<4x8xf32, #tpu.memory_space<smem>>
      %123 = vector.extract_strided_slice %62 {offsets = [32, 0], sizes = [8, 16], strides = [1, 1]} : vector<64x16xf32> to vector<8x16xf32>
      %124 = vector.broadcast %122 : f32 to vector<8x16xf32>
      %125 = arith.mulf %124, %123 : vector<8x16xf32>
      %126 = arith.addf %121, %125 : vector<8x16xf32>
      %c1_83 = arith.constant 1 : index
      %c5_84 = arith.constant 5 : index
      %127 = memref.load %arg5[%c1_83, %c5_84] : memref<4x8xf32, #tpu.memory_space<smem>>
      %128 = vector.extract_strided_slice %62 {offsets = [40, 0], sizes = [8, 16], strides = [1, 1]} : vector<64x16xf32> to vector<8x16xf32>
      %129 = vector.broadcast %127 : f32 to vector<8x16xf32>
      %130 = arith.mulf %129, %128 : vector<8x16xf32>
      %131 = arith.addf %126, %130 : vector<8x16xf32>
      %c1_85 = arith.constant 1 : index
      %c6_86 = arith.constant 6 : index
      %132 = memref.load %arg5[%c1_85, %c6_86] : memref<4x8xf32, #tpu.memory_space<smem>>
      %133 = vector.extract_strided_slice %62 {offsets = [48, 0], sizes = [8, 16], strides = [1, 1]} : vector<64x16xf32> to vector<8x16xf32>
      %134 = vector.broadcast %132 : f32 to vector<8x16xf32>
      %135 = arith.mulf %134, %133 : vector<8x16xf32>
      %136 = arith.addf %131, %135 : vector<8x16xf32>
      %c1_87 = arith.constant 1 : index
      %c7_88 = arith.constant 7 : index
      %137 = memref.load %arg5[%c1_87, %c7_88] : memref<4x8xf32, #tpu.memory_space<smem>>
      %138 = vector.extract_strided_slice %62 {offsets = [56, 0], sizes = [8, 16], strides = [1, 1]} : vector<64x16xf32> to vector<8x16xf32>
      %139 = vector.broadcast %137 : f32 to vector<8x16xf32>
      %140 = arith.mulf %139, %138 : vector<8x16xf32>
      %141 = arith.addf %136, %140 : vector<8x16xf32>
      %c8_89 = arith.constant 8 : index
      %c0_90 = arith.constant 0 : index
      %142 = vector.load %arg9[%c8_89, %c0_90] : memref<32x16xf32, #tpu.memory_space<vmem>>, vector<8x16xf32>
      tpu.vector_store %arg9[%c8_89, %c0_90], %141 {strides = array<i32>} : memref<32x16xf32, #tpu.memory_space<vmem>>, vector<8x16xf32>,
      %c2_91 = arith.constant 2 : index
      %c0_92 = arith.constant 0 : index
      %143 = memref.load %arg5[%c2_91, %c0_92] : memref<4x8xf32, #tpu.memory_space<smem>>
      %144 = vector.extract_strided_slice %62 {offsets = [0, 0], sizes = [8, 16], strides = [1, 1]} : vector<64x16xf32> to vector<8x16xf32>
      %145 = vector.broadcast %143 : f32 to vector<8x16xf32>
      %146 = arith.mulf %145, %144 : vector<8x16xf32>
      %c2_93 = arith.constant 2 : index
      %c1_94 = arith.constant 1 : index
      %147 = memref.load %arg5[%c2_93, %c1_94] : memref<4x8xf32, #tpu.memory_space<smem>>
      %148 = vector.extract_strided_slice %62 {offsets = [8, 0], sizes = [8, 16], strides = [1, 1]} : vector<64x16xf32> to vector<8x16xf32>
      %149 = vector.broadcast %147 : f32 to vector<8x16xf32>
      %150 = arith.mulf %149, %148 : vector<8x16xf32>
      %151 = arith.addf %146, %150 : vector<8x16xf32>
      %c2_95 = arith.constant 2 : index
      %c2_96 = arith.constant 2 : index
      %152 = memref.load %arg5[%c2_95, %c2_96] : memref<4x8xf32, #tpu.memory_space<smem>>
      %153 = vector.extract_strided_slice %62 {offsets = [16, 0], sizes = [8, 16], strides = [1, 1]} : vector<64x16xf32> to vector<8x16xf32>
      %154 = vector.broadcast %152 : f32 to vector<8x16xf32>
      %155 = arith.mulf %154, %153 : vector<8x16xf32>
      %156 = arith.addf %151, %155 : vector<8x16xf32>
      %c2_97 = arith.constant 2 : index
      %c3_98 = arith.constant 3 : index
      %157 = memref.load %arg5[%c2_97, %c3_98] : memref<4x8xf32, #tpu.memory_space<smem>>
      %158 = vector.extract_strided_slice %62 {offsets = [24, 0], sizes = [8, 16], strides = [1, 1]} : vector<64x16xf32> to vector<8x16xf32>
      %159 = vector.broadcast %157 : f32 to vector<8x16xf32>
      %160 = arith.mulf %159, %158 : vector<8x16xf32>
      %161 = arith.addf %156, %160 : vector<8x16xf32>
      %c2_99 = arith.constant 2 : index
      %c4_100 = arith.constant 4 : index
      %162 = memref.load %arg5[%c2_99, %c4_100] : memref<4x8xf32, #tpu.memory_space<smem>>
      %163 = vector.extract_strided_slice %62 {offsets = [32, 0], sizes = [8, 16], strides = [1, 1]} : vector<64x16xf32> to vector<8x16xf32>
      %164 = vector.broadcast %162 : f32 to vector<8x16xf32>
      %165 = arith.mulf %164, %163 : vector<8x16xf32>
      %166 = arith.addf %161, %165 : vector<8x16xf32>
      %c2_101 = arith.constant 2 : index
      %c5_102 = arith.constant 5 : index
      %167 = memref.load %arg5[%c2_101, %c5_102] : memref<4x8xf32, #tpu.memory_space<smem>>
      %168 = vector.extract_strided_slice %62 {offsets = [40, 0], sizes = [8, 16], strides = [1, 1]} : vector<64x16xf32> to vector<8x16xf32>
      %169 = vector.broadcast %167 : f32 to vector<8x16xf32>
      %170 = arith.mulf %169, %168 : vector<8x16xf32>
      %171 = arith.addf %166, %170 : vector<8x16xf32>
      %c2_103 = arith.constant 2 : index
      %c6_104 = arith.constant 6 : index
      %172 = memref.load %arg5[%c2_103, %c6_104] : memref<4x8xf32, #tpu.memory_space<smem>>
      %173 = vector.extract_strided_slice %62 {offsets = [48, 0], sizes = [8, 16], strides = [1, 1]} : vector<64x16xf32> to vector<8x16xf32>
      %174 = vector.broadcast %172 : f32 to vector<8x16xf32>
      %175 = arith.mulf %174, %173 : vector<8x16xf32>
      %176 = arith.addf %171, %175 : vector<8x16xf32>
      %c2_105 = arith.constant 2 : index
      %c7_106 = arith.constant 7 : index
      %177 = memref.load %arg5[%c2_105, %c7_106] : memref<4x8xf32, #tpu.memory_space<smem>>
      %178 = vector.extract_strided_slice %62 {offsets = [56, 0], sizes = [8, 16], strides = [1, 1]} : vector<64x16xf32> to vector<8x16xf32>
      %179 = vector.broadcast %177 : f32 to vector<8x16xf32>
      %180 = arith.mulf %179, %178 : vector<8x16xf32>
      %181 = arith.addf %176, %180 : vector<8x16xf32>
      %c16_107 = arith.constant 16 : index
      %c0_108 = arith.constant 0 : index
      %182 = vector.load %arg9[%c16_107, %c0_108] : memref<32x16xf32, #tpu.memory_space<vmem>>, vector<8x16xf32>
      tpu.vector_store %arg9[%c16_107, %c0_108], %181 {strides = array<i32>} : memref<32x16xf32, #tpu.memory_space<vmem>>, vector<8x16xf32>,
      %c3_109 = arith.constant 3 : index
      %c0_110 = arith.constant 0 : index
      %183 = memref.load %arg5[%c3_109, %c0_110] : memref<4x8xf32, #tpu.memory_space<smem>>
      %184 = vector.extract_strided_slice %62 {offsets = [0, 0], sizes = [8, 16], strides = [1, 1]} : vector<64x16xf32> to vector<8x16xf32>
      %185 = vector.broadcast %183 : f32 to vector<8x16xf32>
      %186 = arith.mulf %185, %184 : vector<8x16xf32>
      %c3_111 = arith.constant 3 : index
      %c1_112 = arith.constant 1 : index
      %187 = memref.load %arg5[%c3_111, %c1_112] : memref<4x8xf32, #tpu.memory_space<smem>>
      %188 = vector.extract_strided_slice %62 {offsets = [8, 0], sizes = [8, 16], strides = [1, 1]} : vector<64x16xf32> to vector<8x16xf32>
      %189 = vector.broadcast %187 : f32 to vector<8x16xf32>
      %190 = arith.mulf %189, %188 : vector<8x16xf32>
      %191 = arith.addf %186, %190 : vector<8x16xf32>
      %c3_113 = arith.constant 3 : index
      %c2_114 = arith.constant 2 : index
      %192 = memref.load %arg5[%c3_113, %c2_114] : memref<4x8xf32, #tpu.memory_space<smem>>
      %193 = vector.extract_strided_slice %62 {offsets = [16, 0], sizes = [8, 16], strides = [1, 1]} : vector<64x16xf32> to vector<8x16xf32>
      %194 = vector.broadcast %192 : f32 to vector<8x16xf32>
      %195 = arith.mulf %194, %193 : vector<8x16xf32>
      %196 = arith.addf %191, %195 : vector<8x16xf32>
      %c3_115 = arith.constant 3 : index
      %c3_116 = arith.constant 3 : index
      %197 = memref.load %arg5[%c3_115, %c3_116] : memref<4x8xf32, #tpu.memory_space<smem>>
      %198 = vector.extract_strided_slice %62 {offsets = [24, 0], sizes = [8, 16], strides = [1, 1]} : vector<64x16xf32> to vector<8x16xf32>
      %199 = vector.broadcast %197 : f32 to vector<8x16xf32>
      %200 = arith.mulf %199, %198 : vector<8x16xf32>
      %201 = arith.addf %196, %200 : vector<8x16xf32>
      %c3_117 = arith.constant 3 : index
      %c4_118 = arith.constant 4 : index
      %202 = memref.load %arg5[%c3_117, %c4_118] : memref<4x8xf32, #tpu.memory_space<smem>>
      %203 = vector.extract_strided_slice %62 {offsets = [32, 0], sizes = [8, 16], strides = [1, 1]} : vector<64x16xf32> to vector<8x16xf32>
      %204 = vector.broadcast %202 : f32 to vector<8x16xf32>
      %205 = arith.mulf %204, %203 : vector<8x16xf32>
      %206 = arith.addf %201, %205 : vector<8x16xf32>
      %c3_119 = arith.constant 3 : index
      %c5_120 = arith.constant 5 : index
      %207 = memref.load %arg5[%c3_119, %c5_120] : memref<4x8xf32, #tpu.memory_space<smem>>
      %208 = vector.extract_strided_slice %62 {offsets = [40, 0], sizes = [8, 16], strides = [1, 1]} : vector<64x16xf32> to vector<8x16xf32>
      %209 = vector.broadcast %207 : f32 to vector<8x16xf32>
      %210 = arith.mulf %209, %208 : vector<8x16xf32>
      %211 = arith.addf %206, %210 : vector<8x16xf32>
      %c3_121 = arith.constant 3 : index
      %c6_122 = arith.constant 6 : index
      %212 = memref.load %arg5[%c3_121, %c6_122] : memref<4x8xf32, #tpu.memory_space<smem>>
      %213 = vector.extract_strided_slice %62 {offsets = [48, 0], sizes = [8, 16], strides = [1, 1]} : vector<64x16xf32> to vector<8x16xf32>
      %214 = vector.broadcast %212 : f32 to vector<8x16xf32>
      %215 = arith.mulf %214, %213 : vector<8x16xf32>
      %216 = arith.addf %211, %215 : vector<8x16xf32>
      %c3_123 = arith.constant 3 : index
      %c7_124 = arith.constant 7 : index
      %217 = memref.load %arg5[%c3_123, %c7_124] : memref<4x8xf32, #tpu.memory_space<smem>>
      %218 = vector.extract_strided_slice %62 {offsets = [56, 0], sizes = [8, 16], strides = [1, 1]} : vector<64x16xf32> to vector<8x16xf32>
      %219 = vector.broadcast %217 : f32 to vector<8x16xf32>
      %220 = arith.mulf %219, %218 : vector<8x16xf32>
      %221 = arith.addf %216, %220 : vector<8x16xf32>
      %c24_125 = arith.constant 24 : index
      %c0_126 = arith.constant 0 : index
      %222 = vector.load %arg9[%c24_125, %c0_126] : memref<32x16xf32, #tpu.memory_space<vmem>>, vector<8x16xf32>
      tpu.vector_store %arg9[%c24_125, %c0_126], %221 {strides = array<i32>} : memref<32x16xf32, #tpu.memory_space<vmem>>, vector<8x16xf32>,
    } else {
    }
    %c0 = arith.constant 0 : index
    %c0_1 = arith.constant 0 : index
    %3 = vector.load %arg4[%c0, %c0_1] : memref<8x8xf32, #tpu.memory_space<vmem>>, vector<8x8xf32>
    %c0_2 = arith.constant 0 : index
    %c0_3 = arith.constant 0 : index
    %4 = vector.load %arg9[%c0_2, %c0_3] : memref<32x16xf32, #tpu.memory_space<vmem>>, vector<8x16xf32>
    %cst = arith.constant dense<0.000000e+00> : vector<8x16xf32>
    %5 = tpu.matmul %3, %4, %cst {dimension_numbers = #tpu.dot_dimension_numbers<[1], [0], [0], [1], [0, 0, 1, 1], [], []>} : vector<8x8xf32>, vector<8x16xf32>, vector<8x16xf32> -> vector<8x16xf32>
    %c0_4 = arith.constant 0 : index
    %c0_5 = arith.constant 0 : index
    %c0_6 = arith.constant 0 : index
    %c0_7 = arith.constant 0 : index
    %6 = vector.load %arg7[%c0_4, %c0_5, %c0_6, %c0_7] : memref<1x4x8x16xf32, #tpu.memory_space<vmem>>, vector<1x1x8x16xf32>
    %7 = vector.shape_cast %6 : vector<1x1x8x16xf32> to vector<8x16xf32>
    %8 = arith.addf %7, %5 : vector<8x16xf32>
    %c0_8 = arith.constant 0 : index
    %9 = memref.load %arg6[%c0_8] : memref<4xf32, #tpu.memory_space<smem>>
    %10 = vector.broadcast %9 : f32 to vector<8x16xf32>
    %11 = arith.addf %8, %10 : vector<8x16xf32>
    %cst_9 = arith.constant 0.000000e+00 : f32
    %12 = vector.broadcast %cst_9 : f32 to vector<8x16xf32>
    %13 = arith.maximumf %11, %12 : vector<8x16xf32>
    %c0_10 = arith.constant 0 : index
    %c0_11 = arith.constant 0 : index
    %c0_12 = arith.constant 0 : index
    %c0_13 = arith.constant 0 : index
    %14 = vector.load %arg8[%c0_10, %c0_11, %c0_12, %c0_13] : memref<1x4x8x16xf32, #tpu.memory_space<vmem>>, vector<1x1x8x16xf32>
    %15 = vector.shape_cast %14 : vector<1x1x8x16xf32> to vector<8x16xf32>
    %16 = vector.shape_cast %13 : vector<8x16xf32> to vector<1x1x8x16xf32>
    tpu.vector_store %arg8[%c0_10, %c0_11, %c0_12, %c0_13], %16 {strides = array<i32>} : memref<1x4x8x16xf32, #tpu.memory_space<vmem>>, vector<1x1x8x16xf32>,
    %c0_14 = arith.constant 0 : index
    %c0_15 = arith.constant 0 : index
    %17 = vector.load %arg4[%c0_14, %c0_15] : memref<8x8xf32, #tpu.memory_space<vmem>>, vector<8x8xf32>
    %c8 = arith.constant 8 : index
    %c0_16 = arith.constant 0 : index
    %18 = vector.load %arg9[%c8, %c0_16] : memref<32x16xf32, #tpu.memory_space<vmem>>, vector<8x16xf32>
    %cst_17 = arith.constant dense<0.000000e+00> : vector<8x16xf32>
    %19 = tpu.matmul %17, %18, %cst_17 {dimension_numbers = #tpu.dot_dimension_numbers<[1], [0], [0], [1], [0, 0, 1, 1], [], []>} : vector<8x8xf32>, vector<8x16xf32>, vector<8x16xf32> -> vector<8x16xf32>
    %c0_18 = arith.constant 0 : index
    %c1 = arith.constant 1 : index
    %c0_19 = arith.constant 0 : index
    %c0_20 = arith.constant 0 : index
    %20 = vector.load %arg7[%c0_18, %c1, %c0_19, %c0_20] : memref<1x4x8x16xf32, #tpu.memory_space<vmem>>, vector<1x1x8x16xf32>
    %21 = vector.shape_cast %20 : vector<1x1x8x16xf32> to vector<8x16xf32>
    %22 = arith.addf %21, %19 : vector<8x16xf32>
    %c1_21 = arith.constant 1 : index
    %23 = memref.load %arg6[%c1_21] : memref<4xf32, #tpu.memory_space<smem>>
    %24 = vector.broadcast %23 : f32 to vector<8x16xf32>
    %25 = arith.addf %22, %24 : vector<8x16xf32>
    %cst_22 = arith.constant 0.000000e+00 : f32
    %26 = vector.broadcast %cst_22 : f32 to vector<8x16xf32>
    %27 = arith.maximumf %25, %26 : vector<8x16xf32>
    %c0_23 = arith.constant 0 : index
    %c1_24 = arith.constant 1 : index
    %c0_25 = arith.constant 0 : index
    %c0_26 = arith.constant 0 : index
    %28 = vector.load %arg8[%c0_23, %c1_24, %c0_25, %c0_26] : memref<1x4x8x16xf32, #tpu.memory_space<vmem>>, vector<1x1x8x16xf32>
    %29 = vector.shape_cast %28 : vector<1x1x8x16xf32> to vector<8x16xf32>
    %30 = vector.shape_cast %27 : vector<8x16xf32> to vector<1x1x8x16xf32>
    tpu.vector_store %arg8[%c0_23, %c1_24, %c0_25, %c0_26], %30 {strides = array<i32>} : memref<1x4x8x16xf32, #tpu.memory_space<vmem>>, vector<1x1x8x16xf32>,
    %c0_27 = arith.constant 0 : index
    %c0_28 = arith.constant 0 : index
    %31 = vector.load %arg4[%c0_27, %c0_28] : memref<8x8xf32, #tpu.memory_space<vmem>>, vector<8x8xf32>
    %c16 = arith.constant 16 : index
    %c0_29 = arith.constant 0 : index
    %32 = vector.load %arg9[%c16, %c0_29] : memref<32x16xf32, #tpu.memory_space<vmem>>, vector<8x16xf32>
    %cst_30 = arith.constant dense<0.000000e+00> : vector<8x16xf32>
    %33 = tpu.matmul %31, %32, %cst_30 {dimension_numbers = #tpu.dot_dimension_numbers<[1], [0], [0], [1], [0, 0, 1, 1], [], []>} : vector<8x8xf32>, vector<8x16xf32>, vector<8x16xf32> -> vector<8x16xf32>
    %c0_31 = arith.constant 0 : index
    %c2 = arith.constant 2 : index
    %c0_32 = arith.constant 0 : index
    %c0_33 = arith.constant 0 : index
    %34 = vector.load %arg7[%c0_31, %c2, %c0_32, %c0_33] : memref<1x4x8x16xf32, #tpu.memory_space<vmem>>, vector<1x1x8x16xf32>
    %35 = vector.shape_cast %34 : vector<1x1x8x16xf32> to vector<8x16xf32>
    %36 = arith.addf %35, %33 : vector<8x16xf32>
    %c2_34 = arith.constant 2 : index
    %37 = memref.load %arg6[%c2_34] : memref<4xf32, #tpu.memory_space<smem>>
    %38 = vector.broadcast %37 : f32 to vector<8x16xf32>
    %39 = arith.addf %36, %38 : vector<8x16xf32>
    %cst_35 = arith.constant 0.000000e+00 : f32
    %40 = vector.broadcast %cst_35 : f32 to vector<8x16xf32>
    %41 = arith.maximumf %39, %40 : vector<8x16xf32>
    %c0_36 = arith.constant 0 : index
    %c2_37 = arith.constant 2 : index
    %c0_38 = arith.constant 0 : index
    %c0_39 = arith.constant 0 : index
    %42 = vector.load %arg8[%c0_36, %c2_37, %c0_38, %c0_39] : memref<1x4x8x16xf32, #tpu.memory_space<vmem>>, vector<1x1x8x16xf32>
    %43 = vector.shape_cast %42 : vector<1x1x8x16xf32> to vector<8x16xf32>
    %44 = vector.shape_cast %41 : vector<8x16xf32> to vector<1x1x8x16xf32>
    tpu.vector_store %arg8[%c0_36, %c2_37, %c0_38, %c0_39], %44 {strides = array<i32>} : memref<1x4x8x16xf32, #tpu.memory_space<vmem>>, vector<1x1x8x16xf32>,
    %c0_40 = arith.constant 0 : index
    %c0_41 = arith.constant 0 : index
    %45 = vector.load %arg4[%c0_40, %c0_41] : memref<8x8xf32, #tpu.memory_space<vmem>>, vector<8x8xf32>
    %c24 = arith.constant 24 : index
    %c0_42 = arith.constant 0 : index
    %46 = vector.load %arg9[%c24, %c0_42] : memref<32x16xf32, #tpu.memory_space<vmem>>, vector<8x16xf32>
    %cst_43 = arith.constant dense<0.000000e+00> : vector<8x16xf32>
    %47 = tpu.matmul %45, %46, %cst_43 {dimension_numbers = #tpu.dot_dimension_numbers<[1], [0], [0], [1], [0, 0, 1, 1], [], []>} : vector<8x8xf32>, vector<8x16xf32>, vector<8x16xf32> -> vector<8x16xf32>
    %c0_44 = arith.constant 0 : index
    %c3 = arith.constant 3 : index
    %c0_45 = arith.constant 0 : index
    %c0_46 = arith.constant 0 : index
    %48 = vector.load %arg7[%c0_44, %c3, %c0_45, %c0_46] : memref<1x4x8x16xf32, #tpu.memory_space<vmem>>, vector<1x1x8x16xf32>
    %49 = vector.shape_cast %48 : vector<1x1x8x16xf32> to vector<8x16xf32>
    %50 = arith.addf %49, %47 : vector<8x16xf32>
    %c3_47 = arith.constant 3 : index
    %51 = memref.load %arg6[%c3_47] : memref<4xf32, #tpu.memory_space<smem>>
    %52 = vector.broadcast %51 : f32 to vector<8x16xf32>
    %53 = arith.addf %50, %52 : vector<8x16xf32>
    %cst_48 = arith.constant 0.000000e+00 : f32
    %54 = vector.broadcast %cst_48 : f32 to vector<8x16xf32>
    %55 = arith.maximumf %53, %54 : vector<8x16xf32>
    %c0_49 = arith.constant 0 : index
    %c3_50 = arith.constant 3 : index
    %c0_51 = arith.constant 0 : index
    %c0_52 = arith.constant 0 : index
    %56 = vector.load %arg8[%c0_49, %c3_50, %c0_51, %c0_52] : memref<1x4x8x16xf32, #tpu.memory_space<vmem>>, vector<1x1x8x16xf32>
    %57 = vector.shape_cast %56 : vector<1x1x8x16xf32> to vector<8x16xf32>
    %58 = vector.shape_cast %55 : vector<8x16xf32> to vector<1x1x8x16xf32>
    tpu.vector_store %arg8[%c0_49, %c3_50, %c0_51, %c0_52], %58 {strides = array<i32>} : memref<1x4x8x16xf32, #tpu.memory_space<vmem>>, vector<1x1x8x16xf32>,
    return
  }
  func.func @transform_0(%arg0: i32, %arg1: i32) -> (i32, i32, i32) {
    %c0_i32 = arith.constant 0 : i32
    %c0_i32_0 = arith.constant 0 : i32
    %c0_i32_1 = arith.constant 0 : i32
    return %arg0, %c0_i32, %c0_i32_0 : i32, i32, i32
  }
  func.func @transform_1(%arg0: i32, %arg1: i32) -> (i32, i32) {
    %c0_i32 = arith.constant 0 : i32
    %c0_i32_0 = arith.constant 0 : i32
    %c0_i32_1 = arith.constant 0 : i32
    return %c0_i32, %c0_i32_0 : i32, i32
  }
  func.func @transform_2(%arg0: i32, %arg1: i32) -> (i32, i32) {
    %c0_i32 = arith.constant 0 : i32
    %c0_i32_0 = arith.constant 0 : i32
    return %arg1, %c0_i32 : i32, i32
  }
  func.func @transform_3(%arg0: i32, %arg1: i32) -> (i32, i32) {
    %c0_i32 = arith.constant 0 : i32
    %c0_i32_0 = arith.constant 0 : i32
    %c0_i32_1 = arith.constant 0 : i32
    return %c0_i32, %c0_i32_0 : i32, i32
  }
  func.func @transform_4(%arg0: i32, %arg1: i32) -> i32 {
    %c0_i32 = arith.constant 0 : i32
    %c0_i32_0 = arith.constant 0 : i32
    return %c0_i32 : i32
  }
  func.func @transform_5(%arg0: i32, %arg1: i32) -> (i32, i32, i32, i32) {
    %c0_i32 = arith.constant 0 : i32
    %c0_i32_0 = arith.constant 0 : i32
    %c0_i32_1 = arith.constant 0 : i32
    return %arg0, %c0_i32, %arg1, %c0_i32_0 : i32, i32, i32, i32
  }
  func.func @transform_6(%arg0: i32, %arg1: i32) -> (i32, i32, i32, i32) {
    %c0_i32 = arith.constant 0 : i32
    %c0_i32_0 = arith.constant 0 : i32
    %c0_i32_1 = arith.constant 0 : i32
    return %arg0, %c0_i32, %arg1, %c0_i32_0 : i32, i32, i32, i32
  }
}

</mosaic_0001>

<bundles_post_ra>
// kernel: tpu_custom_call.1
= control target key start
LH: loop header
LB: loop body
LE: loop exit
PB: predicated region body
PF: predicated region fallthrough
CT: control target
= control target key end

     0   :  { %s1516_s0 = inlined_call_operand.vmem [shape: f32[2,64,8], index: 0, kind: input, shape index: {}]   ;;  %s1517_s1 = inlined_call_operand.vmem [shape: f32[8,16], index: 1, kind: input, shape index: {}]   ;;  %s1518_s2 = inlined_call_operand.vmem [shape: f32[16,8], index: 2, kind: input, shape index: {}]   ;;  %s1519_s3 = inlined_call_operand.vmem [shape: f32[4,8], index: 3, kind: input, shape index: {}]   ;;  %s1520_s4 = inlined_call_operand.vmem [shape: f32[4], index: 4, kind: input, shape index: {}]   ;;  %s1521_s5 = inlined_call_operand.vmem [shape: f32[2,4,16,16], index: 5, kind: input, shape index: {}]   ;;  %s1522_s6 = inlined_call_operand.hbm [shape: f32[2,4,16,16], index: 6, kind: output, shape index: {}]  }
   0x1   :  { %1541 = sst [smem:[#allocation30_spill]] %s1516_s0 }
   0x2   :  { %1542 = sst [smem:[#allocation31_spill]] %s1517_s1 }
   0x3   :  { %1543 = sst [smem:[#allocation32_spill]] %s1518_s2 }
   0x4   :  { %1544 = sst [smem:[#allocation33_spill]] %s1519_s3 }
   0x5   :  { %1545 = sst [smem:[#allocation34_spill]] %s1520_s4 }
   0x6   :  { %1546 = sst [smem:[#allocation35_spill]] %s1521_s5 }
   0x7   :  { %1547 = sst [smem:[#allocation36_spill]] %s1522_s6 }
   0x8   :  { %11 = vsyncpa [#allocation5], 0 }
   0x9   :  { %12 = vsyncpa [#allocation7], 0 }
   0xa   :  { %13 = vsyncpa [#allocation4], 0 }
   0xb   :  { %15 = vsyncpa [#allocation4 + $0x1], 0  ;;  %s1217_s21 = smov 0   ;;  %s1219_s22 = smov 0  }
   0xc   :  { %s1221_s23 = smov 0   ;;  %s1223_s24 = smov 0  }
   0xd   :  { %s1225_s25 = smov 0   ;;  %s1227_s26 = smov 0  }
   0xe   :  { %s1229_s27 = smov 0   ;;  %s1231_s28 = smov 0  }
   0xf LB: > { %1548 = sst [smem:[#allocation13_spill]] %s1147_s21  ;;  %s869_s29 = sadd.s32 4294967295, %s1175_s28   ;;  %s1175_s28 = sphi %s1231_s28, %s21_s28   ;;  %s1171_s27 = sphi %s1229_s27, %s1595_s27   ;;  %s1167_s26 = sphi %s1227_s26, %s1594_s26   ;;  %s1163_s25 = sphi %s1225_s25, %s1593_s25   ;;  %s1159_s24 = sphi %s1223_s24, %s1592_s24   ;;  %s1155_s23 = sphi %s1221_s23, %s1591_s23   ;;  %s1151_s22 = sphi %s1219_s22, %s1590_s22   ;;  %s1147_s21 = sphi %s1217_s21, %s1589_s21  }
  0x10   : > { %1549 = sst [smem:[#allocation14_spill]] %s1151_s22  ;;  %s870_s30 = sadd.s32 4294967294, %s1175_s28  }
  0x11   : > { %1550 = sst [smem:[#allocation15_spill]] %s1155_s23  ;;  %s30_s7 = sadd.s32 1, %s1167_s26 }
  0x12   : > { %1551 = sst [smem:[#allocation16_spill]] %s1159_s24  ;;  %s33_s8 = sadd.s32 1, %s1171_s27 }
  0x13   : > { %1552 = sst [smem:[#allocation17_spill]] %s1163_s25  ;;  %p31_p0 = scmp.ge.s32.totalorder %s30_s7, 2 }
  0x14   : > { %1553 = sst [smem:[#allocation18_spill]] %s1167_s26  ;;  %s157_s9 = sadd.s32 1, %s1155_s23 }
  0x15   : > { %1554 = sst [smem:[#allocation19_spill]] %s1171_s27  ;;  %p164_p1 = scmp.ne.s32.totalorder %s1155_s23, %s1151_s22 }
  0x16   : > { %1555 = sst [smem:[#allocation20_spill]] %s1175_s28  ;;  %p165_p2 = scmp.eq.s32.totalorder %s1175_s28, 0 }
  0x17   : > { %s1597_s7 = smov (%p31_p0, %s30_s7), 0  ;;  %s1599_s8 = smov (!%p31_p0, %s33_s8), %s1171_s27 }
  0x18   : > { %1556 = sst [smem:[#allocation21_spill]] %s1597_s7  ;;  %s153_s10 = ssub.s32 %s1167_s26, %s1597_s7 }
  0x19   : > { %p1270_p3 = por %p165_p2, %p164_p1  ;;  %p35_p4 = scmp.ge.s32.totalorder %s1599_s8, 2 }
  0x1a   : > { %p196_p5 = scmp.eq.s32.totalorder %s869_s29, 3  ;;  %p201_p6 = scmp.ne.s32.totalorder %s1151_s22, %s1147_s21 }
  0x1b   : > { %p202_p7 = scmp.eq.s32.totalorder %s870_s30, 3  ;;  %s1601_s8 = smov (%p35_p4, %s1599_s8), 0 }
  0x1c   : > { %1558 = sst [smem:[#allocation22_spill]] %s1601_s8  ;;  %p1278_p8 = por %p196_p5, %p164_p1 }
  0x1d   : > { %p1282_p9 = por %p202_p7, %p201_p6  ;;  %s152_s14 = ssub.s32 %s1171_s27, %s1601_s8 }
  0x1e   : > { %s1559_s12 = scalar_select %p1278_p8, 1, 0 }
  0x1f   : > { %s1561_s13 = scalar_select %p1282_p9, 1, 0 }
  0x20   : > { %1560 = sst [smem:[#allocation23_spill]] %s1559_s12  ;;  %p871_p10 = scmp.ge.s32.totalorder %s1175_s28, 1 }
  0x21   : > { %1562 = sst [smem:[#allocation24_spill]] %s1561_s13  ;;  %s154_s15 = sor.u32 %s153_s10, %s152_s14 }
  0x22   : > { %p209_p11 = scmp.lt.s32.totalorder %s1175_s28, 5  ;;  %p155_p12 = scmp.eq.s32.totalorder %s154_s15, 0 }
  0x23   : > { %p1294_p0 = scmp.eq.s32.totalorder %s869_s29, 0  ;;  %s1566_s3 = sld [smem:[#allocation33_spill]] }
  0x24   : > { %p1290_p13 = pnand %p871_p10, %p209_p11  ;;  %s1567_s4 = sld [smem:[#allocation34_spill]] }
  0x25   : > { %s1299_s18 = scalar_select %p155_p12, %s1155_s23, %s157_s9  }
  0x26   : > { %p958_p1 = pneg %p1290_p13  ;;  %s1177_s29 = smov [#allocation3]  }
  0x27   : > { %1565 = sst [smem:[#allocation25_spill]] %s1299_s18  ;;  %s1178_s8 = smov [#allocation6]  }
  0x28   : > { %p959_p2 = pnand %p1294_p0, %p958_p1  ;;  %p874_p4 = scmp.ge.s32.totalorder %s1175_s28, 4 }
  0x29   : > { %s224_s30 = sshll.u32 %s1566_s3, 4  ;;  %s225_s30 = int_to_ptr.vmem [resolvable:$true] %s224_s30 }
  0x2a   : > { %s234_s15 = sshll.u32 %s1567_s4, 4  ;;  %241 = sbr.rel (%p874_p4) target bundleno = 61 (0x3d), region = 28  ;;  %s235_s15 = int_to_ptr.vmem [resolvable:$true] %s234_s15 }
  0x2b   : > { %961 = dma.vmem_to_smem (!%p959_p2), %s225_s30, 64, %s1177_s29, [#allocation5]  }
  0x2c   : > { %964 = dma.vmem_to_smem (!%p959_p2), %s235_s15, 16, %s1178_s8, [#allocation7]  }
  0x2f   : > { %259 = sbr.rel (!%p1270_p3) target bundleno = 61 (0x3d), region = 40  ;;  %s261_s9 = sand.u32 (%p1270_p3), 1, %s1155_s23  }
  0x30   : > { %s876_s19 = sshll.u32 (%p1270_p3), %s1171_s27, 3  ;;  %s875_s20 = sshll.u32 (%p1270_p3), %s261_s9, 5 }
  0x31   : > { %s265_s3 = sadd.s32 (%p1270_p3), %s1167_s26, %s876_s19  ;;  %s1568_s5 = sld [smem:[#allocation35_spill]] (%p1270_p3) }
  0x32   : > { %s877_s10 = sshll.u32 (%p1270_p3), %s265_s3, 3  ;;  %s263_s8 = scalar_lea.vmem (%p1270_p3), [#allocation8], %s875_s20 }
  0x37   : > { %s267_s30 = scalar_lea.vmem %s1568_s5, %s877_s10 }
  0x38   : > { %v302_v0 = vld [vmem:[%s267_s30] sm:$0xff]  ;;  %v304_v1 = vld [vmem:[%s267_s30 + $0x10] sm:$0xff] }
  0x39   : > { %v306_v2 = vld [vmem:[%s267_s30 + $0x20] sm:$0xff]  ;;  %303 = vst [vmem:[%s263_s8] sm:$0xff] %v302_v0  ;;  %v308_v3 = vld [vmem:[%s267_s30 + $0x30] sm:$0xff] }
  0x3a   : > { %305 = vst [vmem:[%s263_s8 + $0x8] sm:$0xff] %v304_v1 }
  0x3b   : > { %307 = vst [vmem:[%s263_s8 + $0x10] sm:$0xff] %v306_v2 }
  0x3c   : > { %309 = vst [vmem:[%s263_s8 + $0x18] sm:$0xff] %v308_v3 }
  0x3d PF: > { %318 = sbr.rel (%p1290_p13) target bundleno = 400 (0x190), region = 78 }
  0x42   : > { %1134 = dma.done.wait (%p1294_p0), [#allocation5], 64  }
  0x43   : > { %1136 = vsyncadd (%p1294_p0), [#allocation5], 4294967232 }
  0x44   : > { %1138 = dma.done.wait (%p1294_p0), [#allocation7], 16  }
  0x45   : > { %1140 = vsyncadd (%p1294_p0), [#allocation7], 4294967280  ;;  %s1524_s3 = sand.u32 1, %s1151_s22  }
  0x46   : > { %s881_s4 = sshll.u32 %s1524_s3, 5 }
  0x47   : > { %s1333_s11 = scalar_lea.vmem [#allocation8], %s881_s4 }
  0x48   : > { %1569 = sst [smem:[#allocation26_spill]] %s1333_s11 }
  0x49   : > { %337 = sfence }
  0x4a   : > { %p370_p3 = scmp.lt.s32.totalorder %s1163_s25, 1  ;;  %p375_p5 = scmp.lt.s32.totalorder %s1159_s24, 1 }
  0x4b   : > { %s1570_s0 = sld [smem:[#allocation30_spill]]  ;;  %s1347_s8 = scalar_lea.vmem [#allocation9], %s881_s4 }
  0x4c   : > { %s371_s16 = scalar_select %p370_p3, %s1163_s25, 1 }
  0x4d   : > { %s376_s15 = scalar_select %p375_p5, %s1159_s24, 1 }
  0x4e   : > { %s944_s29 = sshll.u32 %s371_s16, 6  ;;  %s1571_s2 = sld [smem:[#allocation32_spill]] }
  0x4f   : > { %s885_s20 = sshll.u32 %s376_s15, 3  ;;  %1573 = sst [smem:[#allocation28_spill]] %s1347_s8 }
  0x50   : > { %p886_p6 = scmp.ne.s32.totalorder %s1159_s24, 0 }
  0x51   : > { %s374_s19 = scalar_lea.vmem %s1570_s0, %s944_s29 }
  0x52   : > { %382 = sbr.rel (%p886_p6) target bundleno = 249 (0xf9), region = 94 }
  0x54   : > { %s1345_s30 = scalar_lea.vmem %s1571_s2, %s885_s20 }
  0x55   : > { %1572 = sst [smem:[#allocation27_spill]] %s1345_s30 }
  0x57   : > { %s1574_s1 = sld [smem:[#allocation31_spill]]  ;;  %v383_v5 = vld [vmem:[%s374_s19] sm:$0xff]  ;;  %vm392_vm0 = vcmask 64512   ;;  %v385_v7 = vld [vmem:[%s374_s19 + $0x10] sm:$0xff]  ;;  %v384_v9 = vld [vmem:[%s374_s19 + $0x8] sm:$0xff]  ;;  %vm489_vm1 = vcmask 130048  }
  0x58   : > { %v387_v6 = vld [vmem:[%s374_s19 + $0x20] sm:$0xff]  ;;  %v389_v8 = vld [vmem:[%s374_s19 + $0x30] sm:$0xff]  ;;  %v388_v10 = vld [vmem:[%s374_s19 + $0x28] sm:$0xff]  ;;  %s1361_s5 = sld [smem:[#allocation3]] }
  0x59   : > { %v386_v11 = vld [vmem:[%s374_s19 + $0x18] sm:$0xff]  ;;  %s1363_s3 = sld [smem:[#allocation3 + $0x80]] }
  0x5a   : > { %v390_v12 = vld [vmem:[%s374_s19 + $0x38] sm:$0xff]  ;;  %s1365_s4 = sld [smem:[#allocation3 + $0x100]] }
  0x5b   : > { %s1367_s16 = sld [smem:[#allocation3 + $0x180]] }
  0x5c   : > { %s1369_s15 = sld [smem:[#allocation3 + $0x2]] }
  0x5d   : > { %v391_v4 = vld [vmem:[%s1574_s1] sm:$0xff]  ;;  %s1371_s29 = sld [smem:[#allocation3 + $0x82]] }
  0x5e   : > { %432 = vmatpush.msra.mxu0 %v391_v4  ;;  %946 = vmatpush.msra.mxu2 %v391_v4  ;;  %s1373_s9 = sld [smem:[#allocation3 + $0x102]]  ;;  %v459_v13 = vstv %s1361_s5 }
  0x5f   : > { %887 = vmatmul.msk.f32.vlgmr.msra.gmra.mxu0 %vm392_vm0, %v383_v5  ;;  %891 = vmatmul.msk.f32.vlgmr.msra.gmra.mxu2 %vm392_vm0, %v387_v6  ;;  %s1375_s17 = sld [smem:[#allocation3 + $0x182]]  ;;  %v492_v14 = vstv %s1363_s3 }
  0x60   : > { %945 = vmatpush.msra.mxu1 %v391_v4  ;;  %947 = vmatpush.msra.mxu3 %v391_v4  ;;  %s1377_s19 = sld [smem:[#allocation3 + $0x1]]  ;;  %v524_v15 = vstv %s1365_s4 }
  0x61   : > { %889 = vmatmul.msk.f32.vlgmr.msra.gmra.mxu1 %vm392_vm0, %v385_v7  ;;  %893 = vmatmul.msk.f32.vlgmr.msra.gmra.mxu3 %vm392_vm0, %v389_v8  ;;  %s1379_s20 = sld [smem:[#allocation3 + $0x81]]  ;;  %v556_v17 = vstv %s1367_s16 }
  0x62   : > { %s1381_s10 = sld [smem:[#allocation3 + $0x101]]  ;;  %v466_v18 = vstv %s1369_s15 }
  0x63   : > { %s1383_s14 = sld [smem:[#allocation3 + $0x181]]  ;;  %v499_v19 = vstv %s1371_s29 }
  0x64   : > { %s1385_s0 = sld [smem:[#allocation3 + $0x4]]  ;;  %v531_v20 = vstv %s1373_s9 }
  0x65   : > { %s1387_s1 = sld [smem:[#allocation3 + $0x84]]  ;;  %v563_v21 = vstv %s1375_s17 }
  0x66   : > { %s1389_s2 = sld [smem:[#allocation3 + $0x104]]  ;;  %v462_v22 = vstv %s1377_s19 }
  0x67   : > { %888 = vmatmul.msk.f32.gmra.mxu0 %vm392_vm0, %v384_v9  ;;  %892 = vmatmul.msk.f32.gmra.mxu2 %vm392_vm0, %v388_v10  ;;  %s1391_s7 = sld [smem:[#allocation3 + $0x184]]  ;;  %v495_v23 = vstv %s1379_s20 }
  0x68   : > { %s1393_s27 = sld [smem:[#allocation3 + $0x3]]  ;;  %v527_v24 = vstv %s1381_s10 }
  0x69   : > { %890 = vmatmul.msk.f32.gmra.mxu1 %vm392_vm0, %v386_v11  ;;  %894 = vmatmul.msk.f32.gmra.mxu3 %vm392_vm0, %v390_v12  ;;  %s1395_s26 = sld [smem:[#allocation3 + $0x83]]  ;;  %v559_v26 = vstv %s1383_s14 }
  0x6a   : > { %s1397_s18 = sld [smem:[#allocation3 + $0x103]]  ;;  %v474_v27 = vstv %s1385_s0 }
  0x6b   : > { %s1399_s23 = sld [smem:[#allocation3 + $0x183]]  ;;  %v507_v28 = vstv %s1387_s1 }
  0x6c   : > { %s1401_s13 = sld [smem:[#allocation3 + $0x6]]  ;;  %v539_v29 = vstv %s1389_s2 }
  0x6d   : > { %s1403_s21 = sld [smem:[#allocation3 + $0x86]]  ;;  %v571_v30 = vstv %s1391_s7 }
  0x6e   : > { %s1405_s28 = sld [smem:[#allocation3 + $0x106]]  ;;  %v470_v31 = vstv %s1393_s27 }
  0x6f   : > { %s1407_s12 = sld [smem:[#allocation3 + $0x186]]  ;;  %v503_v32 = vstv %s1395_s26 }
  0x70   : > { %s1409_s22 = sld [smem:[#allocation3 + $0x5]]  ;;  %v535_v33 = vstv %s1397_s18 }
  0x71   : > { %s1411_s6 = sld [smem:[#allocation3 + $0x85]]  ;;  %v567_v34 = vstv %s1399_s23 }
  0x72   : > { %s1413_s8 = sld [smem:[#allocation3 + $0x105]]  ;;  %v482_v35 = vstv %s1401_s13 }
  0x73   : > { %s1415_s11 = sld [smem:[#allocation3 + $0x185]]  ;;  %v515_v36 = vstv %s1403_s21 }
  0x74   : > { %s1417_s24 = sld [smem:[#allocation3 + $0x7]]  ;;  %v547_v37 = vstv %s1405_s28 }
  0x75   : > { %s1419_s25 = sld [smem:[#allocation3 + $0x87]]  ;;  %v579_v38 = vstv %s1407_s12 }
  0x76   : > { %s1421_s30 = sld [smem:[#allocation3 + $0x107]]  ;;  %v478_v39 = vstv %s1409_s22 }
  0x77   : > { %1575 = sst [smem:[#allocation29_spill]] %s1411_s6 }
  0x78   : > { %s1426_s6 = sld [smem:[#allocation3 + $0x187]]  ;;  %v543_v41 = vstv %s1413_s8 }
  0x79   : > { %s1576_s5 = sld [smem:[#allocation29_spill]]  ;;  %v575_v43 = vstv %s1415_s11 }
  0x7a   : > { %v486_v44 = vstv %s1417_s24 }
  0x7b   : > { %v519_v45 = vstv %s1419_s25 }
  0x7c   : > { %v551_v46 = vstv %s1421_s30 }
  0x7e   : > { %v583_v50 = vstv %s1426_s6 }
  0x7f   : > { %v511_v40 = vstv %s1576_s5 }
  0xdc   : > { %v434_v16 = vpop.f32.mrf.mxu0 }
  0xdd   : > { %v460_v47 = vmul.f32 %v459_v13, %v434_v16  ;;  %v493_v48 = vmul.f32 %v492_v14, %v434_v16  ;;  %v525_v49 = vmul.f32 %v524_v15, %v434_v16  ;;  %v557_v51 = vmul.f32 %v556_v17, %v434_v16 }
  0xde   : > { %v440_v25 = vpop.f32.mrf.mxu1 }
  0xdf   : > { %v467_v52 = vmul.f32 %v466_v18, %v440_v25  ;;  %v500_v53 = vmul.f32 %v499_v19, %v440_v25  ;;  %v532_v54 = vmul.f32 %v531_v20, %v440_v25  ;;  %v564_v61 = vmul.f32 %v563_v21, %v440_v25 }
  0xe2   : > { %v446_v42 = vpop.f32.mrf.mxu2 }
  0xe3   : > { %v475_v62 = vmul.f32 %v474_v27, %v446_v42  ;;  %v508_v63 = vmul.f32 %v507_v28, %v446_v42  ;;  %v540_v0 = vmul.f32 %v539_v29, %v446_v42  ;;  %v572_v14 = vmul.f32 %v571_v30, %v446_v42 }
  0xe4   : > { %v437_v55 = vpop.f32.mrf.mxu0  ;;  %v452_v56 = vpop.f32.mrf.mxu3 }
  0xe5   : > { %v463_v57 = vmul.f32 %v462_v22, %v437_v55  ;;  %v496_v58 = vmul.f32 %v495_v23, %v437_v55  ;;  %v528_v59 = vmul.f32 %v527_v24, %v437_v55  ;;  %v560_v60 = vmul.f32 %v559_v26, %v437_v55 }
  0xe6   : > { %v443_v1 = vpop.f32.mrf.mxu1  ;;  %v483_v15 = vmul.f32 %v482_v35, %v452_v56  ;;  %v516_v16 = vmul.f32 %v515_v36, %v452_v56  ;;  %v548_v17 = vmul.f32 %v547_v37, %v452_v56 }
  0xe7   : > { %v464_v2 = vadd.f32 %v463_v57, %v460_v47  ;;  %v497_v3 = vadd.f32 %v496_v58, %v493_v48  ;;  %v529_v4 = vadd.f32 %v528_v59, %v525_v49  ;;  %v561_v5 = vadd.f32 %v560_v60, %v557_v51 }
  0xe8   : > { %v471_v6 = vmul.f32 %v470_v31, %v443_v1  ;;  %v504_v7 = vmul.f32 %v503_v32, %v443_v1  ;;  %v536_v8 = vmul.f32 %v535_v33, %v443_v1  ;;  %v568_v9 = vmul.f32 %v567_v34, %v443_v1 }
  0xe9   : > { %v468_v10 = vadd.f32 %v467_v52, %v464_v2  ;;  %v501_v11 = vadd.f32 %v500_v53, %v497_v3  ;;  %v533_v12 = vadd.f32 %v532_v54, %v529_v4  ;;  %v565_v13 = vadd.f32 %v564_v61, %v561_v5 }
  0xea   : > { %v449_v18 = vpop.f32.mrf.mxu2  ;;  %v580_v33 = vmul.f32 %v579_v38, %v452_v56 }
  0xeb   : > { %v472_v19 = vadd.f32 %v471_v6, %v468_v10  ;;  %v505_v20 = vadd.f32 %v504_v7, %v501_v11  ;;  %v537_v21 = vadd.f32 %v536_v8, %v533_v12  ;;  %v569_v22 = vadd.f32 %v568_v9, %v565_v13 }
  0xec   : > { %v479_v23 = vmul.f32 %v478_v39, %v449_v18  ;;  %v512_v24 = vmul.f32 %v511_v40, %v449_v18  ;;  %v544_v25 = vmul.f32 %v543_v41, %v449_v18  ;;  %v576_v26 = vmul.f32 %v575_v43, %v449_v18  ;;  %v455_v27 = vpop.f32.mrf.mxu3 }
  0xed   : > { %v476_v28 = vadd.f32 %v475_v62, %v472_v19  ;;  %v509_v29 = vadd.f32 %v508_v63, %v505_v20  ;;  %v541_v31 = vadd.f32 %v540_v0, %v537_v21  ;;  %v573_v32 = vadd.f32 %v572_v14, %v569_v22 }
  0xee   : > { %v487_v34 = vmul.f32 %v486_v44, %v455_v27  ;;  %v520_v30 = vmul.f32 %v519_v45, %v455_v27  ;;  %v552_v35 = vmul.f32 %v551_v46, %v455_v27  ;;  %v584_v48 = vmul.f32 %v583_v50, %v455_v27 }
  0xef   : > { %v480_v36 = vadd.f32 %v479_v23, %v476_v28  ;;  %v513_v37 = vadd.f32 %v512_v24, %v509_v29  ;;  %v545_v42 = vadd.f32 %v544_v25, %v541_v31  ;;  %v577_v47 = vadd.f32 %v576_v26, %v573_v32 }
  0xf1   : > { %v484_v49 = vadd.f32 %v483_v15, %v480_v36  ;;  %v517_v51 = vadd.f32 %v516_v16, %v513_v37  ;;  %v549_v39 = vadd.f32 %v548_v17, %v545_v42  ;;  %v581_v40 = vadd.f32 %v580_v33, %v577_v47 }
  0xf3   : > { %v488_v41 = vadd.f32 %v487_v34, %v484_v49  ;;  %v521_v43 = vadd.f32 %v520_v30, %v517_v51  ;;  %v553_v52 = vadd.f32 %v552_v35, %v549_v39  ;;  %v585_v53 = vadd.f32 %v584_v48, %v581_v40 }
  0xf5   : > { %490 = vst.msk [vmem:[#allocation2] sm:$0xff] %vm489_vm1, %v488_v41 }
  0xf6   : > { %522 = vst.msk [vmem:[#allocation2 + $0x8] sm:$0xff] %vm489_vm1, %v521_v43 }
  0xf7   : > { %554 = vst.msk [vmem:[#allocation2 + $0x10] sm:$0xff] %vm489_vm1, %v553_v52 }
  0xf8   : > { %586 = vst.msk [vmem:[#allocation2 + $0x18] sm:$0xff] %vm489_vm1, %v585_v53 }
  0xf9 PF: > { %s1577_s0 = sld [smem:[#allocation27_spill]]  ;;  %vm589_vm2 = vcmask 64512   ;;  %vm619_vm3 = vcmask 130048  }
  0xfa   : > { %s1578_s1 = sld [smem:[#allocation17_spill]] }
  0xfb   : > { %s1579_s2 = sld [smem:[#allocation16_spill]] }
  0xfc   : > { %s1580_s6 = sld [smem:[#allocation26_spill]]  ;;  %v588_v46 = vld [vmem:[#allocation2] sm:$0xff] }
  0xfd   : > { %v622_v50 = vld [vmem:[#allocation2 + $0x8] sm:$0xff]  ;;  %608 = vmatpush.msra.mxu0 %v588_v46  ;;  %s615_s21 = sld [smem:[#allocation6]] }
  0xfe   : > { %v656_v38 = vld [vmem:[#allocation2 + $0x10] sm:$0xff]  ;;  %641 = vmatpush.msra.mxu1 %v622_v50  ;;  %s929_s22 = sld [smem:[#allocation6 + $0x1]] }
  0xff   : > { %v690_v44 = vld [vmem:[#allocation2 + $0x18] sm:$0xff]  ;;  %v655_v45 = vld [vmem:[%s1577_s0] sm:$0xff]  ;;  %675 = vmatpush.msra.mxu2 %v656_v38  ;;  %s933_s24 = sld [smem:[#allocation6 + $0x2]] }
 0x100   : > { %709 = vmatpush.msra.mxu3 %v690_v44  ;;  %931 = vmatmul.msk.f32.vlgmr.msra.gmra.mxu2 %vm589_vm2, %v655_v45  ;;  %s940_s23 = sshll.u32 %s1578_s1, 3  ;;  %s937_s25 = sld [smem:[#allocation6 + $0x3]] }
 0x101   : > { %935 = vmatmul.msk.f32.vlgmr.msra.gmra.mxu3 %vm589_vm2, %v655_v45  ;;  %926 = vmatmul.msk.f32.vlgmr.msra.gmra.mxu0 %vm589_vm2, %v655_v45  ;;  %s734_s26 = sadd.s32 %s1579_s2, %s940_s23  ;;  %s1581_s28 = sld [smem:[#allocation28_spill]] }
 0x102   : > { %927 = vmatmul.msk.f32.vlgmr.msra.gmra.mxu1 %vm589_vm2, %v655_v45  ;;  %v613_v54 = vld [vmem:[%s1580_s6] sm:$0xff]  ;;  %v928_v55 = vld [vmem:[%s1580_s6 + $0x8] sm:$0xff]  ;;  %s941_s27 = sshll.u32 %s734_s26, 3  ;;  %v932_v62 = vld [vmem:[%s1580_s6 + $0x10] sm:$0xff]  ;;  %s1582_s13 = sld [smem:[#allocation36_spill]] }
 0x103   : > { %v616_v57 = vstv %s615_s21  ;;  %v936_v63 = vld [vmem:[%s1580_s6 + $0x18] sm:$0xff]  ;;  %s1583_s11 = sld [smem:[#allocation14_spill]] }
 0x104   : > { %v650_v59 = vstv %s929_s22 }
 0x105   : > { %v684_v3 = vstv %s933_s24 }
 0x106   : > { %v718_v5 = vstv %s937_s25 }
 0x107   : > { %s737_s30 = sshll.u32 %s1581_s28, 4  ;;  %s738_s30 = int_to_ptr.vmem [resolvable:$true] %s737_s30 }
 0x108   : > { %s736_s18 = scalar_lea.hbm %s1582_s13, %s941_s27  ;;  %s1093_s19 = scalar_lea.hbm %s1582_s13, 128 }
 0x109   : > { %s739_s8 = sshll.u32 %s736_s18, 4  ;;  %s1585_s4 = sand.u32 1, %s1583_s11   ;;  %s740_s8 = int_to_ptr.hbm [resolvable:$true] %s739_s8 }
 0x10a   : > { %s724_s16 = scalar_lea.sflag [#allocation4], %s1585_s4  ;;  %s1087_s15 = sshra.s32 %s740_s8, 4  ;;  %s1088_s15 = int_to_ptr.hbm [resolvable:$true] %s1087_s15 }
 0x10b   : > { %s1089_s29 = scalar_lea.hbm %s1088_s15, 32  ;;  %p1094_p12 = scmp.lt.s32.totalorder %s1088_s15, %s1582_s13 }
 0x10c   : > { %p1090_p7 = scmp.ne.s32.totalorder %s1088_s15, %s1089_s29  ;;  %p1095_p13 = scmp.lt.s32.totalorder %s1093_s19, %s1089_s29 }
 0x10e   : > { %p1091_p10 = pnand %p1090_p7, %p1278_p8  ;;  %p1096_p0 = por %p1095_p13, %p1094_p12 }
 0x110   : > { %p1092_p11 = pneg %p1091_p10 }
 0x112   : > { %p1097_p1 = pnand %p1096_p0, %p1092_p11 }
 0x17e   : > { %v610_v56 = vpop.f32.mrf.mxu0 }
 0x17f   : > { %v643_v58 = vpop.f32.mrf.mxu1  ;;  %v614_v60 = vadd.f32 %v613_v54, %v610_v56 }
 0x180   : > { %v648_v61 = vadd.f32 %v928_v55, %v643_v58 }
 0x181   : > { %v617_v0 = vadd.f32 %v616_v57, %v614_v60 }
 0x182   : > { %v651_v1 = vadd.f32 %v650_v59, %v648_v61 }
 0x183   : > { %v677_v2 = vpop.f32.mrf.mxu2  ;;  %v618_v6 = vmax.f32 %v617_v0, 0.0 }
 0x184   : > { %v711_v4 = vpop.f32.mrf.mxu3  ;;  %v652_v7 = vmax.f32 %v651_v1, 0.0  ;;  %v682_v8 = vadd.f32 %v932_v62, %v677_v2 }
 0x185   : > { %v716_v9 = vadd.f32 %v936_v63, %v711_v4  ;;  %620 = vst.msk [vmem:[%s1581_s28] sm:$0xff] %vm619_vm3, %v618_v6 }
 0x186   : > { %v685_v10 = vadd.f32 %v684_v3, %v682_v8  ;;  %930 = vst.msk [vmem:[%s1581_s28 + $0x8] sm:$0xff] %vm619_vm3, %v652_v7 }
 0x187   : > { %v719_v11 = vadd.f32 %v718_v5, %v716_v9 }
 0x188   : > { %v686_v12 = vmax.f32 %v685_v10, 0.0 }
 0x189   : > { %v720_v13 = vmax.f32 %v719_v11, 0.0 }
 0x18a   : > { %934 = vst.msk [vmem:[%s1581_s28 + $0x10] sm:$0xff] %vm619_vm3, %v686_v12 }
 0x18b   : > { %938 = vst.msk [vmem:[%s1581_s28 + $0x18] sm:$0xff] %vm619_vm3, %v720_v13 }
 0x18c   : > { %1100 = shalt.err (!%p1097_p1)
}
 0x18d   : > { %s1179_s14 = smov 128   ;;  %s1180_s5 = smov 256  }
 0x18e   : > { %s1181_s0 = smov 8  }
 0x18f   : > { %956 = dma.vmem_to_hbm [thread:$0]  (%p1278_p8), %s738_s30, 512, %s740_s8, %s724_s16, %s1179_s14, %s1180_s5, %s1181_s0  }
 0x190 PF: > { %s1586_s1 = sld [smem:[#allocation20_spill]] }
 0x191   : > { %s1587_s2 = sld [smem:[#allocation13_spill]] }
 0x196   : > { %p973_p2 = scmp.ge.s32.totalorder %s1586_s1, 2 }
 0x197   : > { %s754_s21 = sand.u32 1, %s1587_s2  }
 0x198   : > { %p966_p4 = pnand %p973_p2, %p1282_p9  ;;  %s755_s22 = scalar_lea.sflag [#allocation4], %s754_s21 }
 0x19a   : > { %p967_p3 = pneg %p966_p4 }
 0x19c   : > { %1142 = dma.done.wait (%p967_p3), %s755_s22, 512  }
 0x19d   : > { %1144 = vsyncadd (%p967_p3), %s755_s22, 4294966784  ;;  %s21_s28 = sadd.s32 1, %s1586_s1   ;;  %s1589_s21 = sld [smem:[#allocation14_spill]] }
 0x19e   : > { %p18_p5 = scmp.ge.s32.totalorder %s21_s28, 6   ;;  %s1590_s22 = sld [smem:[#allocation15_spill]] }
 0x19f   : > { %s1591_s23 = sld [smem:[#allocation25_spill]] }
 0x1a0   : > { %s1592_s24 = sld [smem:[#allocation18_spill]]  ;;  %20 = sbr.rel (!%p18_p5) target bundleno = 15 (0xf), region = 147 }
 0x1a1   : > { %s1593_s25 = sld [smem:[#allocation19_spill]] }
 0x1a2   : > { %s1594_s26 = sld [smem:[#allocation21_spill]] }
 0x1a3   : > { %s1595_s27 = sld [smem:[#allocation22_spill]] }
 0x1a5   :  { %761 = vsyncpa [#allocation4], 1 }
 0x1a6   :  { %763 = vsyncpa [#allocation4 + $0x1], 1 }
 0x1a7   :  { %764 = vsyncpa [#allocation5], 1 }
 0x1a8   :  { %766 = vsyncpa [#allocation5 + $0x1], 1 }
 0x1a9   :  { %767 = vsyncpa [#allocation7], 1 }

</bundles_post_ra>
